<compile_context>
chip_gen: v7x
topology: tpu7x:2x2x1
jax: 0.10.0
libtpu: 0.0.40
codegen_flags: <defaults>
</compile_context>

<pallas_src>
import functools

import jax
import jax.numpy as jnp
from jax.experimental import pallas as pl
from jax.experimental.pallas import tpu as pltpu


def _kd_loss_kernel(stu_ref, tea_ref, out_ref, *, inv_t, tile_n, n_rows):
    """One [tile_n, C] block: per-row KL(teacher || student), reduced to a scalar."""
    s = stu_ref[...].astype(jnp.float32) * inv_t
    t = tea_ref[...].astype(jnp.float32) * inv_t

    # Student branch: only the per-row log-sum-exp is needed (no log_q tile).
    s_max = jnp.max(s, axis=1, keepdims=True)
    s_shift = s - s_max
    s_lse = jnp.log(jnp.sum(jnp.exp(s_shift), axis=1, keepdims=True))

    # Teacher branch: keep the un-normalized exp; normalize once per row.
    t_max = jnp.max(t, axis=1, keepdims=True)
    t_shift = t - t_max
    t_exp = jnp.exp(t_shift)
    t_sum = jnp.sum(t_exp, axis=1, keepdims=True)

    # KL(p || q) per row, refactored to avoid materializing log-softmax tiles:
    #   row_kl = sum_c t_exp*(t_shift - s_shift) / t_sum - log(t_sum) + s_lse
    num = jnp.sum(t_exp * (t_shift - s_shift), axis=1, keepdims=True)
    # Per-row (not per-element) divide. Exact reciprocal kept: the f32 1e-5
    # tolerance demands it; approx=True (EUP vrcp) is a free swap otherwise.
    row_kl = num * pl.reciprocal(t_sum) - jnp.log(t_sum) + s_lse

    if n_rows % tile_n != 0:
        # Remainder tile: rows past n_rows hold undefined data; zero them.
        row_idx = (pl.program_id(0) * tile_n
                   + jax.lax.broadcasted_iota(jnp.int32, (tile_n, 1), 0))
        row_kl = jnp.where(row_idx < n_rows, row_kl, 0.0)

    # One partial sum per grid step, written as a lane-dense (8, 128) slab
    # (unmasked vst, tiling-rule compliant). Final reduction reads [:, 0, 0].
    partial = jnp.sum(row_kl, keepdims=True)            # (1, 1)
    out_ref[...] = jnp.broadcast_to(partial, (1, 8, 128))


def _vmem_limit_bytes():
    """Generation-aware scoped-VMEM limit: ~3/4 of physical, capped at 96 MiB."""
    default_cap = 64 * 1024 * 1024          # conservative (v7x per-TC VMEM)
    try:
        cap = int(getattr(pltpu.get_tpu_info(), "vmem_capacity_bytes",
                          default_cap))
    except Exception:
        cap = default_cap
    # v5e/v6e (128 MiB) -> 96 MiB; v7x (64 MiB) -> 48 MiB.
    return max(32 * 1024 * 1024, min(96 * 1024 * 1024, (cap * 3) // 4))


def _choose_tile_n(n, c, itemsize, vmem_limit_bytes):
    """Largest row-tile that fits ~half the scoped-VMEM budget, divisor-friendly."""
    # Per row: 2 inputs x 2 pipeline buffers x C x itemsize
    #        + ~8 f32 [tile_n, C]-shaped temporaries the compiler materializes.
    per_row = c * (4 * itemsize + 8 * 4)
    rows = (vmem_limit_bytes // 2) // max(per_row, 1)
    rows = max(8, (rows // 8) * 8)

    if rows >= n:
        # Whole batch fits in one tile. Split in two (if cheaply possible) so
        # the v7x megacore 'parallel' axis has work for both TensorCores.
        if n > 8 and n % 16 == 0:
            return n // 2
        return n

    # Prefer a tile that divides n exactly: no remainder mask compiled into
    # every step, no padded last input/output DMA. Bounded search.
    cand = rows
    for _ in range(256):
        if cand < 8:
            break
        if n % cand == 0:
            return cand
        cand -= 8
    return rows


def kd_loss(stu_pred, tea_pred, T):
    """Pallas implementation of KDLoss(T)(stu_pred, tea_pred)."""
    assert stu_pred.shape == tea_pred.shape and stu_pred.ndim == 2
    n, c = stu_pred.shape
    itemsize = jnp.dtype(stu_pred.dtype).itemsize
    vmem_limit = _vmem_limit_bytes()
    tile_n = _choose_tile_n(n, c, itemsize, vmem_limit)
    num_tiles = pl.cdiv(n, tile_n)

    kernel = functools.partial(
        _kd_loss_kernel, inv_t=1.0 / float(T), tile_n=tile_n, n_rows=n
    )

    partials = pl.pallas_call(
        kernel,
        grid=(num_tiles,),
        in_specs=[
            pl.BlockSpec((tile_n, c), lambda i: (i, 0)),
            pl.BlockSpec((tile_n, c), lambda i: (i, 0)),
        ],
        out_specs=pl.BlockSpec((1, 8, 128), lambda i: (i, 0, 0)),
        out_shape=jax.ShapeDtypeStruct((num_tiles, 8, 128), jnp.float32),
        compiler_params=pltpu.CompilerParams(
            dimension_semantics=("parallel",),
            vmem_limit_bytes=vmem_limit,
        ),
    )(stu_pred, tea_pred)

    # Tiny final reduction + the T^2 / batch_size scale applied once, in XLA.
    return jnp.sum(partials[:, 0, 0]) * (float(T) * float(T) / float(n))


def _kd_loss_ref(stu_pred, tea_pred, T):
    """Pure-JAX reference mirroring the PyTorch forward."""
    s = jax.nn.log_softmax(stu_pred / T, axis=1)
    p = jax.nn.softmax(tea_pred / T, axis=1)
    kl = jnp.sum(p * (jnp.log(p) - s))
    return kl * (T ** 2) / stu_pred.shape[0]


if __name__ == "__main__":
    key = jax.random.PRNGKey(0)
    k1, k2 = jax.random.split(key)
    # Small logits shape consistent with KDLoss usage (lane-dense class axis).
    N, C = 16, 128
    T = 4.0

    stu = jax.random.normal(k1, (N, C), dtype=jnp.float32)
    tea = jax.random.normal(k2, (N, C), dtype=jnp.float32)

    loss = jax.block_until_ready(kd_loss(stu, tea, T))
    ref = jax.block_until_ready(_kd_loss_ref(stu, tea, T))

    assert jnp.allclose(loss, ref, rtol=1e-5, atol=1e-5), (loss, ref)
    print("KERNEL_OK")
</pallas_src>

<mosaic_0001>
module attributes {stable_mosaic.version = 11 : i64} {
  func.func @_kd_loss_kernel(%arg0: i32, %arg1: memref<8x128xf32, #tpu.memory_space<vmem>>, %arg2: memref<8x128xf32, #tpu.memory_space<vmem>>, %arg3: memref<1x8x128xf32, #tpu.memory_space<vmem>>) attributes {dimension_semantics = [#tpu.dimension_semantics<parallel>], iteration_bounds = array<i64: 2>, scalar_prefetch = 0 : i64, scratch_operands = 0 : i64, tpu.core_type = #tpu.core_type<tc>, window_params = [{transform_indices = @transform_0, window_bounds = array<i64: 8, 128>}, {transform_indices = @transform_1, window_bounds = array<i64: 8, 128>}, {transform_indices = @transform_2, window_bounds = array<i64: 1, 8, 128>}]} {
    %c0 = arith.constant 0 : index
    %c0_0 = arith.constant 0 : index
    %0 = vector.load %arg1[%c0, %c0_0] : memref<8x128xf32, #tpu.memory_space<vmem>>, vector<8x128xf32>
    %cst = arith.constant 2.500000e-01 : f32
    %1 = vector.broadcast %cst : f32 to vector<8x128xf32>
    %2 = arith.mulf %0, %1 : vector<8x128xf32>
    %c0_1 = arith.constant 0 : index
    %c0_2 = arith.constant 0 : index
    %3 = vector.load %arg2[%c0_1, %c0_2] : memref<8x128xf32, #tpu.memory_space<vmem>>, vector<8x128xf32>
    %cst_3 = arith.constant 2.500000e-01 : f32
    %4 = vector.broadcast %cst_3 : f32 to vector<8x128xf32>
    %5 = arith.mulf %3, %4 : vector<8x128xf32>
    %cst_4 = arith.constant dense<0xFF800000> : vector<8xf32>
    %6 = vector.multi_reduction <maximumf>, %2, %cst_4 [1] : vector<8x128xf32> to vector<8xf32>
    %7 = vector.shape_cast %6 : vector<8xf32> to vector<8x1xf32>
    %8 = vector.broadcast %7 : vector<8x1xf32> to vector<8x128xf32>
    %9 = arith.subf %2, %8 : vector<8x128xf32>
    %10 = math.exp %9 : vector<8x128xf32>
    %cst_5 = arith.constant dense<0.000000e+00> : vector<8xf32>
    %11 = vector.multi_reduction <add>, %10, %cst_5 [1] : vector<8x128xf32> to vector<8xf32>
    %12 = vector.shape_cast %11 : vector<8xf32> to vector<8x1xf32>
    %13 = math.log %12 : vector<8x1xf32>
    %cst_6 = arith.constant dense<0xFF800000> : vector<8xf32>
    %14 = vector.multi_reduction <maximumf>, %5, %cst_6 [1] : vector<8x128xf32> to vector<8xf32>
    %15 = vector.shape_cast %14 : vector<8xf32> to vector<8x1xf32>
    %16 = vector.broadcast %15 : vector<8x1xf32> to vector<8x128xf32>
    %17 = arith.subf %5, %16 : vector<8x128xf32>
    %18 = math.exp %17 : vector<8x128xf32>
    %cst_7 = arith.constant dense<0.000000e+00> : vector<8xf32>
    %19 = vector.multi_reduction <add>, %18, %cst_7 [1] : vector<8x128xf32> to vector<8xf32>
    %20 = vector.shape_cast %19 : vector<8xf32> to vector<8x1xf32>
    %21 = arith.subf %17, %9 : vector<8x128xf32>
    %22 = arith.mulf %18, %21 : vector<8x128xf32>
    %cst_8 = arith.constant dense<0.000000e+00> : vector<8xf32>
    %23 = vector.multi_reduction <add>, %22, %cst_8 [1] : vector<8x128xf32> to vector<8xf32>
    %24 = vector.shape_cast %23 : vector<8xf32> to vector<8x1xf32>
    %25 = tpu.reciprocal %20 : vector<8x1xf32> -> vector<8x1xf32>
    %26 = arith.mulf %24, %25 : vector<8x1xf32>
    %27 = math.log %20 : vector<8x1xf32>
    %28 = arith.subf %26, %27 : vector<8x1xf32>
    %29 = arith.addf %28, %13 : vector<8x1xf32>
    %30 = vector.shape_cast %29 : vector<8x1xf32> to vector<1x8x1xf32>
    %cst_9 = arith.constant dense<0.000000e+00> : vector<1xf32>
    %31 = vector.multi_reduction <add>, %30, %cst_9 [1, 2] : vector<1x8x1xf32> to vector<1xf32>
    %32 = vector.shape_cast %31 : vector<1xf32> to vector<1x1x1xf32>
    %33 = vector.extract %32[0, 0, 0] : f32 from vector<1x1x1xf32>
    %34 = vector.broadcast %33 : f32 to vector<1x1xf32>
    %35 = vector.shape_cast %34 : vector<1x1xf32> to vector<1x1x1xf32>
    %36 = vector.broadcast %35 : vector<1x1x1xf32> to vector<1x8x128xf32>
    %c0_10 = arith.constant 0 : index
    %c0_11 = arith.constant 0 : index
    %c0_12 = arith.constant 0 : index
    %37 = vector.load %arg3[%c0_10, %c0_11, %c0_12] : memref<1x8x128xf32, #tpu.memory_space<vmem>>, vector<1x8x128xf32>
    tpu.vector_store %arg3[%c0_10, %c0_11, %c0_12], %36 {strides = array<i32>} : memref<1x8x128xf32, #tpu.memory_space<vmem>>, vector<1x8x128xf32>,
    return
  }
  func.func @transform_0(%arg0: i32) -> (i32, i32) {
    %c0_i32 = arith.constant 0 : i32
    %c0_i32_0 = arith.constant 0 : i32
    return %arg0, %c0_i32 : i32, i32
  }
  func.func @transform_1(%arg0: i32) -> (i32, i32) {
    %c0_i32 = arith.constant 0 : i32
    %c0_i32_0 = arith.constant 0 : i32
    return %arg0, %c0_i32 : i32, i32
  }
  func.func @transform_2(%arg0: i32) -> (i32, i32, i32) {
    %c0_i32 = arith.constant 0 : i32
    %c0_i32_0 = arith.constant 0 : i32
    %c0_i32_1 = arith.constant 0 : i32
    return %arg0, %c0_i32, %c0_i32_0 : i32, i32, i32
  }
}

</mosaic_0001>

<bundles_post_ra>
// kernel: tpu_custom_call.1
= control target key start
LH: loop header
LB: loop body
LE: loop exit
PB: predicated region body
PF: predicated region fallthrough
CT: control target
= control target key end

     0   :  { %7 = vsyncpa [#allocation3], 0  ;;  %s788_s0 = inlined_call_operand.hbm [shape: f32[16,128], index: 0, kind: input, shape index: {}]   ;;  %s789_s1 = inlined_call_operand.hbm [shape: f32[16,128], index: 1, kind: input, shape index: {}]   ;;  %s790_s2 = inlined_call_operand.hbm [shape: f32[2,8,128], index: 2, kind: output, shape index: {}]  }
   0x1   :  { %9 = vsyncpa [#allocation3 + $0x1], 0 }
   0x2   :  { %10 = vsyncpa [#allocation6], 0 }
   0x3   :  { %12 = vsyncpa [#allocation6 + $0x1], 0 }
   0x4   :  { %13 = vsyncpa [#allocation4], 0 }
   0x5   :  { %15 = vsyncpa [#allocation4 + $0x1], 0  ;;  %s574_s9 = smov 0   ;;  %s576_s10 = smov 0  }
   0x6   :  { %s578_s11 = smov 0   ;;  %s580_s12 = smov 0  }
   0x7 LB: > { %s595_s13 = sadd.s32 4294967295, %s554_s12   ;;  %s346_s14 = sadd.s32 4294967294, %s554_s12   ;;  %s554_s12 = sphi %s580_s12, %s809_s12   ;;  %s550_s11 = sphi %s578_s11, %s808_s11   ;;  %s546_s10 = sphi %s576_s10, %s807_s10   ;;  %s542_s9 = sphi %s574_s9, %s806_s9  }
   0x8   : > { %s599_s15 = sadd.s32 1, %s554_s12   ;;  %s28_s16 = sadd.s32 1, %s550_s11 }
   0x9   : > { %s25_s17 = ssub.s32 %s554_s12, %s599_s15  ;;  %p35_p0 = scmp.ne.s32.totalorder %s550_s11, %s546_s10 }
   0xa   : > { %p26_p1 = scmp.eq.s32.totalorder %s25_s17, 0  ;;  %p36_p2 = scmp.eq.s32.totalorder %s554_s12, 0 }
   0xb   : > { %p41_p3 = scmp.ne.s32.totalorder %s546_s10, %s542_s9  ;;  %p42_p4 = scmp.eq.s32.totalorder %s595_s13, 0 }
   0xc   : > { %s611_s18 = scalar_select %p26_p1, %s550_s11, %s28_s16  }
   0xd   : > { %p613_p5 = por %p36_p2, %p35_p0  ;;  %p617_p6 = por %p42_p4, %p41_p3 }
   0xe   : > { %p91_p7 = scmp.eq.s32.totalorder %s595_s13, 1  ;;  %p97_p8 = scmp.eq.s32.totalorder %s346_s14, 1 }
   0xf   : > { %s794_s20 = scalar_select %p617_p6, 1, 0 }
  0x10   : > { %p380_p10 = scmp.lt.s32.totalorder %s554_s12, 2  ;;  %p624_p11 = por %p91_p7, %p35_p0 }
  0x11   : > { %p628_p12 = por %p97_p8, %p41_p3  ;;  %s633_s23 = sand.u32 1, %s550_s11  }
  0x12   : > { %s795_s21 = scalar_select %p624_p11, 1, 0 }
  0x13   : > { %s796_s22 = scalar_select %p628_p12, 1, 0 }
  0x14   : > { %s350_s24 = sshll.u32 %s554_s12, 7  ;;  %s349_s25 = sshll.u32 %s633_s23, 3 }
  0x15   : > { %s642_s28 = scalar_lea.hbm %s788_s0, %s350_s24  ;;  %s121_s29 = scalar_lea.vmem [#allocation2], %s349_s25 }
  0x16   : > { %s128_s30 = sshll.u32 %s121_s29, 4  ;;  %p648_p13 = pnand %p380_p10, %p613_p5  ;;  %s652_s30 = int_to_ptr.vmem [resolvable:$true] %s128_s30 }
  0x17   : > { %s118_s4 = scalar_lea.sflag [#allocation3], %s633_s23  ;;  %s424_s5 = scalar_lea.hbm %s642_s28, 128 }
  0x18   : > { %p425_p2 = scmp.ne.s32.totalorder %s642_s28, %s424_s5  ;;  %p426_p3 = pneg %p648_p13 }
  0x19   : > { %s429_s8 = scalar_lea.hbm %s788_s0, 256  ;;  %p430_p5 = scmp.lt.u32.totalorder %s642_s28, %s788_s0 }
  0x1a   : > { %p427_p4 = pnand %p426_p3, %p425_p2  ;;  %p431_p8 = scmp.lt.u32.totalorder %s429_s8, %s424_s5 }
  0x1b   : > { %p433_p9 = scmp.lt.u32.totalorder %s424_s5, %s642_s28 }
  0x1c   : > { %p428_p7 = pneg %p427_p4  ;;  %p432_p10 = por %p431_p8, %p430_p5 }
  0x1e   : > { %p434_p0 = por %p433_p9, %p432_p10 }
  0x20   : > { %p435_p1 = pnand %p434_p0, %p428_p7 }
  0x22   : > { %438 = shalt.err (!%p435_p1)
}
  0x23   : > { %s439_s17 = scalar_lea.vmem %s652_s30, 128  ;;  %s556_s19 = smov [#allocation2]  }
  0x24   : > { %p440_p2 = scmp.ne.s32.totalorder %s652_s30, %s439_s17  ;;  %s444_s26 = sshll.u32 %s556_s19, 4  ;;  %s445_s26 = int_to_ptr.vmem [resolvable:$false] %s444_s26 }
  0x25   : > { %s446_s27 = scalar_lea.vmem %s445_s26, 256  ;;  %p447_p11 = scmp.lt.s32.totalorder %s652_s30, %s445_s26 }
  0x26   : > { %p442_p4 = pnand %p440_p2, %p426_p3  ;;  %p448_p5 = scmp.lt.s32.totalorder %s446_s27, %s439_s17 }
  0x28   : > { %p443_p12 = pneg %p442_p4  ;;  %p449_p8 = por %p448_p5, %p447_p11 }
  0x2a   : > { %p450_p9 = pnand %p449_p8, %p443_p12 }
  0x2c   : > { %453 = shalt.err (!%p450_p9)
}
  0x2d   : > { %372 = dma.hbm_to_vmem [thread:$0]  (!%p648_p13), %s642_s28, 128, %s652_s30, %s118_s4  }
  0x2e   : > { %p798_p0 = scmp.lt.s32.totalorder %s554_s12, 3  ;;  %p799_p1 = scmp.ge.s32.totalorder %s554_s12, 1 }
  0x2f   : > { %s695_s7 = scalar_lea.hbm %s789_s1, %s350_s24  ;;  %s139_s8 = scalar_lea.vmem [#allocation5], %s349_s25 }
  0x30   : > { %p686_p7 = pnand %p799_p1, %p798_p0  ;;  %s146_s14 = sshll.u32 %s139_s8, 4  ;;  %s147_s14 = int_to_ptr.vmem [resolvable:$true] %s146_s14 }
  0x31   : > { %s136_s28 = scalar_lea.sflag [#allocation6], %s633_s23  ;;  %s454_s30 = scalar_lea.hbm %s695_s7, 128 }
  0x32   : > { %s800_s29 = scalar_select %p686_p7, 1, 0 }
  0x33   : > { %p455_p11 = scmp.ne.s32.totalorder %s695_s7, %s454_s30  ;;  %s459_s24 = scalar_lea.hbm %s789_s1, 256 }
  0x34   : > { %p460_p2 = scmp.lt.u32.totalorder %s695_s7, %s789_s1  ;;  %p461_p4 = scmp.lt.u32.totalorder %s459_s24, %s454_s30 }
  0x35   : > { %p457_p12 = pnand %p455_p11, %p426_p3  ;;  %p463_p8 = scmp.lt.u32.totalorder %s454_s30, %s695_s7 }
  0x36   : > { %p462_p5 = por %p461_p4, %p460_p2 }
  0x37   : > { %p458_p10 = pneg %p457_p12 }
  0x38   : > { %p464_p9 = por %p463_p8, %p462_p5 }
  0x3a   : > { %p465_p0 = pnand %p464_p9, %p458_p10 }
  0x3c   : > { %468 = shalt.err (!%p465_p0)
}
  0x3d   : > { %s469_s23 = scalar_lea.vmem %s147_s14, 128  ;;  %s557_s25 = smov [#allocation5]  }
  0x3e   : > { %p470_p1 = scmp.ne.s32.totalorder %s147_s14, %s469_s23  ;;  %s474_s26 = sshll.u32 %s557_s25, 4  ;;  %s475_s26 = int_to_ptr.vmem [resolvable:$false] %s474_s26 }
  0x3f   : > { %s476_s27 = scalar_lea.vmem %s475_s26, 256  ;;  %p477_p6 = scmp.lt.s32.totalorder %s147_s14, %s475_s26 }
  0x40   : > { %p472_p11 = pnand %p470_p1, %p426_p3  ;;  %p478_p7 = scmp.lt.s32.totalorder %s476_s27, %s469_s23 }
  0x42   : > { %p473_p12 = pneg %p472_p11  ;;  %p479_p2 = por %p478_p7, %p477_p6 }
  0x44   : > { %p480_p4 = pnand %p479_p2, %p473_p12 }
  0x46   : > { %483 = shalt.err (!%p480_p4)
}
  0x47   : > { %375 = dma.hbm_to_vmem [thread:$0]  (!%p648_p13), %s695_s7, 128, %s147_s14, %s136_s28  }
  0x48   : > { %p801_p10 = scmp.ne.s32.totalorder %s800_s29, 0 }
  0x49   : > { %s722_s5 = sand.u32 (!%p801_p10), 1, %s546_s10   ;;  %p802_p6 = scmp.ne.s32.totalorder (!%p801_p10), %s794_s20, 0 }
  0x4a   : > { %155 = sbr.rel (%p801_p10) target bundleno = 625 (0x271), region = 28  ;;  %s725_s6 = sshll.u32 (!%p801_p10), %s722_s5, 3 }
  0x4b   : > { %s158_s8 = scalar_lea.sflag (!%p801_p10), [#allocation3], %s722_s5  ;;  %s161_s30 = scalar_lea.vmem (!%p801_p10), [#allocation2], %s725_s6 }
  0x51   : > { %529 = dma.done.wait (%p802_p6), %s158_s8, 128  }
  0x52   : > { %531 = vsyncadd (%p802_p6), %s158_s8, 4294967168  ;;  %s167_s3 = scalar_lea.sflag [#allocation6], %s722_s5  ;;  %s170_s29 = scalar_lea.vmem [#allocation5], %s725_s6 }
  0x53   : > { %533 = dma.done.wait (%p802_p6), %s167_s3, 128  }
  0x54   : > { %535 = vsyncadd (%p802_p6), %s167_s3, 4294967168  ;;  %v198_v0 = vld [vmem:[%s170_s29] sm:$0xff]  ;;  %v196_v1 = vld [vmem:[%s161_s30] sm:$0xff]  ;;  %vm226_vm0 = vcmask 7168   ;;  %s195_s20 = scalar_lea.vmem [#allocation7], %s725_s6  ;;  %s358_s14 = sshll.u32 %s595_s13, 7 }
  0x55   : > { %v199_v2 = vmul.f32 0.25, %v198_v0  ;;  %v197_v3 = vmul.f32 0.25, %v196_v1  ;;  %s253_s7 = sshll.u32 %s195_s20, 4  ;;  %s746_s24 = scalar_lea.hbm %s790_s2, %s358_s14  ;;  %s741_s7 = int_to_ptr.vmem [resolvable:$true] %s253_s7 }
  0x56   : > { %s240_s17 = scalar_lea.sflag [#allocation4], %s722_s5  ;;  %s484_s19 = scalar_lea.vmem %s741_s7, 128 }
  0x57   : > { %209 = vmax.xlane.f32.xlu0 %v199_v2  ;;  %p485_p13 = scmp.ne.s32.totalorder %s741_s7, %s484_s19  ;;  %p803_p3 = scmp.ne.s32.totalorder %s795_s21, 0 }
  0x58   : > { %s558_s13 = smov [#allocation7]  }
  0x59   : > { %p486_p7 = pnand %p485_p13, %p803_p3  ;;  %s488_s23 = sshll.u32 %s558_s13, 4  ;;  %s489_s23 = int_to_ptr.vmem [resolvable:$false] %s488_s23 }
  0x5a   : > { %s490_s25 = scalar_lea.vmem %s489_s23, 256  ;;  %p491_p8 = scmp.lt.s32.totalorder %s741_s7, %s489_s23 }
  0x5b   : > { %200 = vmax.xlane.f32.xlu0 %v197_v3  ;;  %p487_p5 = pneg %p486_p7  ;;  %p492_p9 = scmp.lt.s32.totalorder %s490_s25, %s484_s19 }
  0x5d   : > { %p493_p0 = por %p492_p9, %p491_p8 }
  0x5f   : > { %p494_p1 = pnand %p493_p0, %p487_p5 }
  0xe4   : > { %v210_v4 = vpop.xlane.xlu0 %209 }
  0xe5   : > { %v211_v5 = vsub.f32 %v199_v2, %v210_v4 }
  0xe7   : > { %v212_v6 = vmul.f32 1.442695, %v211_v5 }
  0xe8   : > { %v201_v7 = vpop.xlane.xlu0 %200 }
  0xe9   : > { %414 = vpow2.f32 %v212_v6  ;;  %v202_v8 = vsub.f32 %v197_v3, %v201_v7 }
  0xeb   : > { %v203_v9 = vmul.f32 1.442695, %v202_v8  ;;  %v216_v10 = vsub.f32 %v211_v5, %v202_v8 }
  0xed   : > { %416 = vpow2.f32 %v203_v9 }
  0xf3   : > { %v415_v11 = vpop.eup %414 }
  0xf4   : > { %214 = vadd.xlane.f32.xlu1 %v415_v11  ;;  %v217_v12 = vmul.f32 %v415_v11, %v216_v10 }
  0xf6   : > { %218 = vadd.xlane.f32.xlu0 %v217_v12 }
  0xf7   : > { %v417_v13 = vpop.eup %416 }
  0xf8   : > { %205 = vadd.xlane.f32.xlu1 %v417_v13 }
 0x181   : > { %v215_v14 = vpop.xlane.xlu1 %214 }
 0x182   : > { %418 = vrcp.f32 %v215_v14 }
 0x183   : > { %420 = vlog2.f32 %v215_v14  ;;  %v219_v17 = vpop.xlane.xlu0 %218 }
 0x185   : > { %v206_v15 = vpop.xlane.xlu1 %205 }
 0x186   : > { %422 = vlog2.f32 %v206_v15 }
 0x18c   : > { %v419_v16 = vpop.eup %418 }
 0x18d   : > { %v421_v18 = vpop.eup %420  ;;  %v221_v19 = vmul.f32 %v419_v16, %v219_v17 }
 0x18e   : > { %v223_v20 = vmul.f32 0.6931472, %v421_v18 }
 0x190   : > { %v423_v21 = vpop.eup %422  ;;  %v224_v22 = vsub.f32 %v221_v19, %v223_v20 }
 0x191   : > { %v208_v23 = vmul.f32 0.6931472, %v423_v21 }
 0x193   : > { %v225_v24 = vadd.f32 %v224_v22, %v208_v23 }
 0x195   : > { %v227_v25 = vsel %vm226_vm0, %v225_v24, 0.0 }
 0x196   : > { %228 = vadd.xlane.f32.xlu1 %v227_v25 }
 0x223   : > { %v229_v26 = vpop.xlane.xlu1 %228 }
 0x224   : > { %v230_v27 = vrot.slane %v229_v26, 4 }
 0x226   : > { %v231_v28 = vadd.f32 %v230_v27, %v229_v26 }
 0x228   : > { %v232_v29 = vrot.slane %v231_v28, 2 }
 0x22a   : > { %v233_v30 = vadd.f32 %v232_v29, %v231_v28 }
 0x22c   : > { %v234_v31 = vrot.slane %v233_v30, 1 }
 0x22e   : > { %v235_v32 = vadd.f32 %v234_v31, %v233_v30 }
 0x230   : > { %361 = vpush %v235_v32 }
 0x261   : > { %s362_s28 = spop %361 }
 0x262   : > { %v237_v33 = vstv %s362_s28 }
 0x263   : > { %238 = vst [vmem:[%s195_s20] sm:$0xff] %v237_v33 }
 0x264   : > { %497 = shalt.err (!%p494_p1)
}
 0x265   : > { %s498_s26 = scalar_lea.hbm %s746_s24, 128  ;;  %s502_s6 = scalar_lea.hbm %s790_s2, 256 }
 0x266   : > { %p499_p11 = scmp.ne.s32.totalorder %s746_s24, %s498_s26  ;;  %p503_p4 = scmp.lt.u32.totalorder %s746_s24, %s790_s2 }
 0x267   : > { %p504_p10 = scmp.lt.u32.totalorder %s502_s6, %s498_s26  ;;  %p506_p13 = scmp.lt.u32.totalorder %s498_s26, %s746_s24 }
 0x268   : > { %p500_p12 = pnand %p499_p11, %p803_p3 }
 0x269   : > { %p505_p6 = por %p504_p10, %p503_p4 }
 0x26a   : > { %p501_p2 = pneg %p500_p12 }
 0x26b   : > { %p507_p7 = por %p506_p13, %p505_p6 }
 0x26d   : > { %p508_p5 = pnand %p507_p7, %p501_p2 }
 0x26f   : > { %511 = shalt.err (!%p508_p5)
}
 0x270   : > { %367 = dma.vmem_to_hbm [thread:$0]  (%p803_p3), %s741_s7, 128, %s746_s24, %s240_s17  }
 0x271 PF: > { %s265_s3 = sand.u32 1, %s542_s9   ;;  %p804_p8 = scmp.ne.s32.totalorder %s796_s22, 0 }
 0x272   : > { %p805_p9 = scmp.ge.s32.totalorder %s554_s12, 2  ;;  %s266_s29 = scalar_lea.sflag [#allocation4], %s265_s3 }
 0x274   : > { %p377_p0 = pnand %p805_p9, %p804_p8 }
 0x276   : > { %537 = dma.done.wait (!%p377_p0), %s266_s29, 128  }
 0x277   : > { %539 = vsyncadd (!%p377_p0), %s266_s29, 4294967168  ;;  %p18_p1 = scmp.ge.s32.totalorder %s599_s15, 4   ;;  %s806_s9 = smov %s546_s10 }
 0x278   : > { %s807_s10 = smov %s550_s11  ;;  %s808_s11 = smov %s611_s18 }
 0x279   : > { %s809_s12 = smov %s599_s15  ;;  %20 = sbr.rel (!%p18_p1) target bundleno = 7 (0x7), region = 86 }
 0x280   :  { %271 = vsyncpa [#allocation3], 1 }
 0x281   :  { %273 = vsyncpa [#allocation3 + $0x1], 1 }
 0x282   :  { %274 = vsyncpa [#allocation6], 1 }
 0x283   :  { %276 = vsyncpa [#allocation6 + $0x1], 1 }
 0x284   :  { %277 = vsyncpa [#allocation4], 1 }
 0x285   :  { %279 = vsyncpa [#allocation4 + $0x1], 1 }

</bundles_post_ra>
